<compile_context>
chip_gen: v5e
topology: v5e:2x2
jax: 0.10.0
libtpu: 0.0.40
codegen_flags: <defaults>
</compile_context>

<pallas_src>
import functools

import jax
import jax.numpy as jnp
from jax import lax
from jax.experimental import pallas as pl
from jax.experimental.pallas import tpu as pltpu


# ------------------------------- small helpers --------------------------------
def _cdiv(a, b):
    return (a + b - 1) // b


def _round_up(x, m):
    return ((x + m - 1) // m) * m


def _round_down(x, m):
    return (x // m) * m


def _tpu_vmem_limit():
    """Generation-aware scoped-VMEM ceiling with headroom below physical VMEM."""
    try:
        phys = int(pltpu.get_tpu_info().vmem_capacity_bytes)
    except Exception:
        phys = 128 << 20
    # v7x: 64 MiB physical -> ~48 MiB cap; v5e/v6e: 128 MiB -> ~96 MiB cap.
    return min(phys * 3 // 4, 100 << 20)


def _choose_tk(c, hw, itemsize, vmem_limit):
    """Largest 128-aligned contraction tile that fits the VMEM budget.

    Budget: 2 pipeline buffers of the (C, tk) input tile + 1 temp for the lane-mask
    select + double-buffered resident (C, C) f32 output + compiler headroom.
    """
    resident = 4 * c * c * 4
    headroom = 4 << 20
    budget = max(vmem_limit - resident - headroom, 2 << 20)
    per_buf = min(budget // 3, 12 << 20)          # keep each buffer a sane DMA size
    tk = max(_round_down(per_buf // (itemsize * c), 128), 128)
    tk = min(tk, _round_up(hw, 128))              # never bigger than the padded extent
    return tk


# ----------------------------- Gram partial kernel ----------------------------
def _gram_partial_kernel(x_ref, g_ref, *, hw, tk, nk_per_split, mask_cols):
    """g_ref (resident (C,C) f32, one per split) += X[:, k-tile] @ X[:, k-tile].T."""
    p = pl.program_id(0)        # core / split index ("parallel")
    k = pl.program_id(1)        # contraction step ("arbitrary")

    @pl.when(k == 0)
    def _():
        g_ref[...] = jnp.zeros_like(g_ref)

    xk = x_ref[...]             # (C, tk); edge blocks may hold garbage past column hw
    if mask_cols:
        # Zero lanes past the true spatial extent (Pallas does NOT zero the OOB part of
        # an edge block) and fully zero phantom blocks of an uneven split.  The select
        # is VPU work fully hidden under the tile DMA.
        start = (p * nk_per_split + k) * tk
        col = start + lax.broadcasted_iota(jnp.int32, xk.shape, 1)
        xk = jnp.where(col < hw, xk, jnp.zeros_like(xk))

    # Contract the last axis of both operands (A @ A.T): natural lane-major layout,
    # f32 accumulation on the MXU regardless of input dtype.
    g_ref[...] += lax.dot_general(
        xk, xk,
        dimension_numbers=(((1,), (1,)), ((), ())),
        preferred_element_type=jnp.float32,
    )


def gram_partials(x_flat, *, num_splits=2, tk=None):
    """x_flat: (C, HW). Returns (S, C, C) f32 partial Gram matrices (sum over S = X@X.T)."""
    c, hw = x_flat.shape
    itemsize = x_flat.dtype.itemsize
    vmem_limit = _tpu_vmem_limit()
    if tk is None:
        tk = _choose_tk(c, hw, itemsize, vmem_limit)

    n_k_total = _cdiv(hw, tk)
    num_splits = max(1, min(num_splits, n_k_total))
    nk_per = _cdiv(n_k_total, num_splits)
    has_phantom = num_splits * nk_per != n_k_total
    mask_cols = (hw % tk != 0) or has_phantom
    last_block = n_k_total - 1

    def x_index(p, k):
        blk = p * nk_per + k
        if has_phantom:
            # Clamp phantom blocks in-bounds; their contribution is zeroed in-kernel.
            blk = jnp.minimum(blk, last_block)
        return (0, blk)

    kernel = functools.partial(
        _gram_partial_kernel, hw=hw, tk=tk, nk_per_split=nk_per, mask_cols=mask_cols)

    tile_bytes = c * tk * itemsize
    vmem_req = (2 + (1 if mask_cols else 0)) * tile_bytes + 4 * c * c * 4 + (4 << 20)
    cparams = pltpu.CompilerParams(
        dimension_semantics=("parallel", "arbitrary"),
        vmem_limit_bytes=int(min(max(vmem_req, 32 << 20), vmem_limit)),
    )

    return pl.pallas_call(
        kernel,
        out_shape=jax.ShapeDtypeStruct((num_splits, c, c), jnp.float32),
        grid_spec=pltpu.PrefetchScalarGridSpec(
            num_scalar_prefetch=0,
            grid=(num_splits, nk_per),
            in_specs=[pl.BlockSpec((c, tk), x_index)],
            out_specs=pl.BlockSpec((None, c, c), lambda p, k: (p, 0, 0)),
        ),
        compiler_params=cparams,
    )(x_flat)


# ------------------------------ LossStyle wrapper ------------------------------
def loss_style_forward(x_nchw, *, strength, normalize, mode="None", target=None,
                       use_bf16=False, num_splits=2, tk=None):
    """Mirrors LossStyle.forward. Returns (input, G, loss_or_None).

    x_nchw: (1, C, H, W) — batch must be 1 (torch .view(c, h*w) requires it).
    mode 'capture' is host-side target bookkeeping of G (no extra device compute);
    GradsScale / `normalize` only affect backward, not forward values.
    """
    b, c, h, w = x_nchw.shape
    assert b == 1, "GramMtx's view(c, h*w) only works for batch size 1"
    nelem = b * c * h * w
    x_flat = x_nchw.reshape(c, h * w)                 # glue: reshape stays in plain JAX
    if use_bf16:
        # Halves HBM traffic for this bandwidth-bound kernel; MXU still accumulates f32.
        x_flat = x_flat.astype(jnp.bfloat16)

    partials = gram_partials(x_flat, num_splits=num_splits, tk=tk)
    # Tiny O(C^2) epilogue in plain JAX: sum per-core partials, .div(input.nelement()).
    g = jnp.sum(partials, axis=0) * (1.0 / float(nelem))

    if mode == "loss":
        assert target is not None
        loss = float(strength) * jnp.mean((g - target.astype(jnp.float32)) ** 2)
        return x_nchw, g, loss
    return x_nchw, g, None


# ------------------------------------ main ------------------------------------
if __name__ == "__main__":
    key = jax.random.PRNGKey(0)
    B, C, H, W = 1, 8, 16, 16                         # small shapes; HW = 256
    x = jax.random.normal(key, (B, C, H, W), dtype=jnp.float32)

    # Default mode 'None': compute G, return input unchanged.
    out, g, _ = loss_style_forward(x, strength=5.0, normalize=True, mode="None")
    jax.block_until_ready(g)

    xf = x.reshape(C, H * W)
    g_ref = (xf @ xf.T) / float(x.size)
    assert jnp.allclose(g, g_ref, rtol=1e-5, atol=1e-5), "Gram mismatch"
    assert out.shape == x.shape and jnp.array_equal(out, x), "forward must return input"

    # 'loss' mode: MSE against a captured target, scaled by strength.
    target = g_ref + 0.01 * jax.random.normal(jax.random.PRNGKey(1), g_ref.shape,
                                              dtype=jnp.float32)
    _, g2, loss = loss_style_forward(x, strength=5.0, normalize=True, mode="loss",
                                     target=target)
    jax.block_until_ready(loss)
    loss_ref = 5.0 * jnp.mean((g_ref - target) ** 2)
    assert jnp.allclose(g2, g_ref, rtol=1e-5, atol=1e-5), "Gram mismatch (loss mode)"
    assert jnp.allclose(loss, loss_ref, rtol=1e-5, atol=1e-6), "loss mismatch"

    # Non-lane-aligned spatial size (9*13 = 117): exercises the in-kernel tail mask
    # (no jnp.pad HBM round-trip).
    x2 = jax.random.normal(jax.random.PRNGKey(2), (1, 8, 9, 13), dtype=jnp.float32)
    _, g3, _ = loss_style_forward(x2, strength=1.0, normalize=False, mode="None")
    jax.block_until_ready(g3)
    xf2 = x2.reshape(8, 9 * 13)
    g3_ref = (xf2 @ xf2.T) / float(x2.size)
    assert jnp.allclose(g3, g3_ref, rtol=1e-5, atol=1e-5), "Gram mismatch (ragged tail)"

    # Forced tiny tile on HW=320: 3 k-blocks split unevenly over 2 "cores" -> exercises
    # the uneven split, phantom-block clamp, and tail mask together (loss mode too).
    x3 = jax.random.normal(jax.random.PRNGKey(3), (1, 8, 16, 20), dtype=jnp.float32)
    xf3 = x3.reshape(8, 320)
    g4_ref = (xf3 @ xf3.T) / float(x3.size)
    t3 = g4_ref * 0.9
    _, g4, loss4 = loss_style_forward(x3, strength=2.0, normalize=True, mode="loss",
                                      target=t3, tk=128)
    jax.block_until_ready(loss4)
    loss4_ref = 2.0 * jnp.mean((g4_ref - t3) ** 2)
    assert jnp.allclose(g4, g4_ref, rtol=1e-5, atol=1e-5), "Gram mismatch (uneven split)"
    assert jnp.allclose(loss4, loss4_ref, rtol=1e-5, atol=1e-6), "loss mismatch (uneven split)"

    # Optional bf16 activation path (halved HBM traffic); compare vs bf16-quantized ref.
    _, g5, _ = loss_style_forward(x, strength=1.0, normalize=False, mode="None",
                                  use_bf16=True)
    jax.block_until_ready(g5)
    xf_bf = xf.astype(jnp.bfloat16).astype(jnp.float32)
    g5_ref = (xf_bf @ xf_bf.T) / float(x.size)
    assert jnp.allclose(g5, g5_ref, rtol=2e-2, atol=1e-3), "Gram mismatch (bf16 path)"

    print("KERNEL_OK")
</pallas_src>

<mosaic_0001>
module attributes {stable_mosaic.version = 11 : i64} {
  func.func @_gram_partial_kernel(%arg0: i32, %arg1: i32, %arg2: memref<8x256xf32, #tpu.memory_space<vmem>>, %arg3: memref<1x8x8xf32, #tpu.memory_space<vmem>>) attributes {dimension_semantics = [#tpu.dimension_semantics<parallel>, #tpu.dimension_semantics<arbitrary>], iteration_bounds = array<i64: 1, 1>, scalar_prefetch = 0 : i64, scratch_operands = 0 : i64, tpu.core_type = #tpu.core_type<tc>, window_params = [{transform_indices = @transform_0, window_bounds = array<i64: 8, 256>}, {transform_indices = @transform_1, window_bounds = array<i64: 1, 8, 8>}]} {
    %c0_i32 = arith.constant 0 : i32
    %0 = arith.cmpi eq, %arg1, %c0_i32 : i32
    %1 = arith.extui %0 : i1 to i32
    %c0_i32_0 = arith.constant 0 : i32
    %2 = arith.cmpi ne, %1, %c0_i32_0 : i32
    scf.if %2 {
      %cst_8 = arith.constant 0.000000e+00 : f32
      %11 = vector.broadcast %cst_8 : f32 to vector<8x8xf32>
      %c0_9 = arith.constant 0 : index
      %c0_10 = arith.constant 0 : index
      %c0_11 = arith.constant 0 : index
      %12 = vector.load %arg3[%c0_9, %c0_10, %c0_11] : memref<1x8x8xf32, #tpu.memory_space<vmem>>, vector<1x8x8xf32>
      %13 = vector.shape_cast %12 : vector<1x8x8xf32> to vector<8x8xf32>
      %14 = vector.shape_cast %11 : vector<8x8xf32> to vector<1x8x8xf32>
      tpu.vector_store %arg3[%c0_9, %c0_10, %c0_11], %14 {strides = array<i32>} : memref<1x8x8xf32, #tpu.memory_space<vmem>>, vector<1x8x8xf32>,
    } else {
    }
    %c0 = arith.constant 0 : index
    %c0_1 = arith.constant 0 : index
    %3 = vector.load %arg2[%c0, %c0_1] : memref<8x256xf32, #tpu.memory_space<vmem>>, vector<8x256xf32>
    %c0_2 = arith.constant 0 : index
    %c0_3 = arith.constant 0 : index
    %c0_4 = arith.constant 0 : index
    %4 = vector.load %arg3[%c0_2, %c0_3, %c0_4] : memref<1x8x8xf32, #tpu.memory_space<vmem>>, vector<1x8x8xf32>
    %5 = vector.shape_cast %4 : vector<1x8x8xf32> to vector<8x8xf32>
    %cst = arith.constant dense<0.000000e+00> : vector<8x8xf32>
    %6 = tpu.matmul %3, %3, %cst {dimension_numbers = #tpu.dot_dimension_numbers<[1], [1], [0], [0], [0, 0, 1, 0], [], []>} : vector<8x256xf32>, vector<8x256xf32>, vector<8x8xf32> -> vector<8x8xf32>
    %7 = arith.addf %5, %6 : vector<8x8xf32>
    %c0_5 = arith.constant 0 : index
    %c0_6 = arith.constant 0 : index
    %c0_7 = arith.constant 0 : index
    %8 = vector.load %arg3[%c0_5, %c0_6, %c0_7] : memref<1x8x8xf32, #tpu.memory_space<vmem>>, vector<1x8x8xf32>
    %9 = vector.shape_cast %8 : vector<1x8x8xf32> to vector<8x8xf32>
    %10 = vector.shape_cast %7 : vector<8x8xf32> to vector<1x8x8xf32>
    tpu.vector_store %arg3[%c0_5, %c0_6, %c0_7], %10 {strides = array<i32>} : memref<1x8x8xf32, #tpu.memory_space<vmem>>, vector<1x8x8xf32>,
    return
  }
  func.func @transform_0(%arg0: i32, %arg1: i32) -> (i32, i32) {
    %c1_i32 = arith.constant 1 : i32
    %0 = arith.muli %arg0, %c1_i32 : i32
    %1 = arith.addi %0, %arg1 : i32
    %c0_i32 = arith.constant 0 : i32
    %c0_i32_0 = arith.constant 0 : i32
    return %c0_i32, %1 : i32, i32
  }
  func.func @transform_1(%arg0: i32, %arg1: i32) -> (i32, i32, i32) {
    %c0_i32 = arith.constant 0 : i32
    %c0_i32_0 = arith.constant 0 : i32
    %c0_i32_1 = arith.constant 0 : i32
    return %arg0, %c0_i32, %c0_i32_0 : i32, i32, i32
  }
}

</mosaic_0001>

<bundles_post_ra>
// kernel: tpu_custom_call.1
= control target key start
LH: loop header
LB: loop body
LE: loop exit
PB: predicated region body
PF: predicated region fallthrough
CT: control target
= control target key end

     0   :  { %6 = vsyncpa [#allocation3], 0  ;;  %s174_s0 = inlined_call_operand.hbm [shape: f32[8,256], index: 0, kind: input, shape index: {}]   ;;  %s175_s1 = inlined_call_operand.hbm [shape: f32[1,8,8], index: 1, kind: output, shape index: {}]  }
   0x1   :  { %7 = vsyncpa [#allocation4], 0  ;;  %s17_s8 = sshll.u32 %s174_s0, 4  ;;  %s153_s9 = smov [#allocation2]   ;;  %s18_s8 = int_to_ptr.hbm [resolvable:$true] %s17_s8 }
   0x2   :  { %s19_s10 = sshll.u32 %s153_s9, 4  ;;  %s20_s10 = int_to_ptr.vmem [resolvable:$true] %s19_s10 }
   0x3   :  { %22 = dma.hbm_to_vmem [thread:$0]  %s18_s8, 256, %s20_s10, [#allocation3]  }
   0x4   :  { %149 = dma.done.wait [#allocation3], 256  }
   0x5   :  { %150 = vsyncadd [#allocation3], 4294967040  ;;  %vm33_vm0 = vcmask 64512   ;;  %v154_v0 = vmov 0.0   ;;  %v35_v1 = vld [vmem:[#allocation2] sm:$0xff]  ;;  %v36_v2 = vld [vmem:[#allocation2 + $0x8] sm:$0xff] }
   0x6   :  { %34 = vst.msk [vmem:[#allocation5] sm:$0xff] %vm33_vm0, %v154_v0  ;;  %53 = vmatpush.xpose.msra.mxu0 %v35_v1  ;;  %73 = vmatpush.xpose.msra.mxu1 %v36_v2  ;;  %s155_s0 = smov [#allocation5]   ;;  %s88_s14 = sshll.u32 %s175_s1, 4  ;;  %s89_s14 = int_to_ptr.hbm [resolvable:$true] %s88_s14 }
   0x7   :  { %s86_s11 = sshll.u32 %s155_s0, 4  ;;  %s87_s11 = int_to_ptr.vmem [resolvable:$true] %s86_s11 }
   0x9   :  { %54 = vmatmul.f32.vlgmr.msra.gmra.mxu0 %v35_v1  ;;  %74 = vmatmul.f32.vlgmr.msra.gmra.mxu1 %v36_v2 }
   0xd   :  { %v37_v4 = vld [vmem:[#allocation5] sm:$0xff] }
  0x86   :  { %v55_v3 = vpop.f32.mrf.mxu0  ;;  %v75_v5 = vpop.f32.mrf.mxu1 }
  0x87   :  { %v76_v6 = vadd.f32 %v75_v5, %v55_v3 }
  0x89   :  { %v78_v7 = vadd.f32 %v76_v6, %v37_v4 }
  0x8b   :  { %80 = vst.msk [vmem:[#allocation5] sm:$0xff] %vm33_vm0, %v78_v7 }
  0x8c   :  { %91 = dma.vmem_to_hbm [thread:$0]  %s87_s11, 128, %s89_s14, [#allocation4]  }
  0x8d   :  { %151 = dma.done.wait [#allocation4], 128  }
  0x8e   :  { %152 = vsyncadd [#allocation4], 4294967168 }
  0x8f   :  { %96 = vsyncpa [#allocation3], 1 }
  0x90   :  { %97 = vsyncpa [#allocation4], 1 }

</bundles_post_ra>
